<compile_context>
chip_gen: v6e
topology: v6e:2x2x1
jax: 0.10.0
libtpu: 0.0.40
codegen_flags: <defaults>
</compile_context>

<pallas_src>
import functools

import jax
import jax.numpy as jnp
from jax.experimental import pallas as pl
from jax.experimental.pallas import tpu as pltpu

LANE = 128      # hidden/action dims are zero-padded to full lane width
SUBLANE = 8     # f32 sublane granularity for the batch axis
TB_MAX = 1024   # max batch rows per grid step (keeps per-tile VMEM ~2-3 MiB)
NEG_MASK = -1e30  # finite "minus infinity" baked into padded b2 columns


def _round_up(n, m):
    return -(-n // m) * m


def policy_net_kernel(x_ref, w1_ref, b1_ref, w2_ref, b2_ref, out_ref):
    # fc1: bf16 MXU matmul with f32 accumulation; bias + ReLU in f32 (VPU).
    h = jnp.dot(x_ref[...].astype(jnp.bfloat16), w1_ref[...],
                preferred_element_type=jnp.float32) + b1_ref[...]
    h = jnp.maximum(h, 0.0)

    # fc2: padded w2 rows are 0 and padded b2 columns are -1e30, so the padded
    # logit lanes arrive pre-masked (no iota/where needed in the kernel).
    logits = jnp.dot(h.astype(jnp.bfloat16), w2_ref[...],
                     preferred_element_type=jnp.float32) + b2_ref[...]

    # Numerically stable softmax over dim=1, all in f32; exact divide so each
    # row sums to 1 to f32 precision. Padded lanes get exp(-1e30 - m) == 0.
    # TODO(synk): if profiling shows the EUP slot binding, compute the exp in
    # bf16 on v6e/v7x only (v5e EUP has no bf16).
    m = jnp.max(logits, axis=1, keepdims=True)
    e = jnp.exp(logits - m)
    p = e / jnp.sum(e, axis=1, keepdims=True)
    out_ref[...] = p.astype(out_ref.dtype)


@functools.partial(jax.jit, static_argnames=("action_dim", "out_dtype"))
def policy_net_forward(x, w1p, b1p, w2p, b2p, *, action_dim, out_dtype=jnp.float32):
    """x: (B, state_dim) f32; params are the padded outputs of pad_params()."""
    B, state_dim = x.shape
    H_pad = w1p.shape[1]
    A_pad = w2p.shape[1]

    # Batch tiling: pad to a sublane multiple and split into >= 2 tiles whenever
    # possible so the "parallel" axis can use both TensorCores on v7x.
    B_pad = _round_up(B, SUBLANE)
    num_tiles = pl.cdiv(B_pad, TB_MAX)
    if B_pad >= 2 * SUBLANE:
        num_tiles = max(num_tiles, 2)
    TB = _round_up(pl.cdiv(B_pad, num_tiles), SUBLANE)
    B_pad = num_tiles * TB
    if B_pad != B:
        x = jnp.pad(x, ((0, B_pad - B), (0, 0)))
    grid = (num_tiles,)

    # Weights/biases: full blocks, constant index_map -> VMEM-resident across
    # all grid steps; single-buffered (no point double-buffering a fixed block).
    def const_spec(a):
        return pl.BlockSpec(a.shape, lambda i: (0,) * a.ndim,
                            pipeline_mode=pl.Buffered(1))

    out_bytes = B_pad * A_pad * jnp.dtype(out_dtype).itemsize
    bytes_accessed = (4 * B_pad * state_dim + out_bytes
                      + 2 * (w1p.size + w2p.size) + 4 * (b1p.size + b2p.size))
    flops = 2 * B_pad * (state_dim * H_pad + H_pad * A_pad)

    out = pl.pallas_call(
        policy_net_kernel,
        out_shape=jax.ShapeDtypeStruct((B_pad, A_pad), out_dtype),
        grid=grid,
        in_specs=[
            # x stays un-padded on the lane axis: its per-tile DMA is already
            # contiguous full rows and fc1 is a small fraction of the FLOPs.
            pl.BlockSpec((TB, state_dim), lambda i: (i, 0)),
            const_spec(w1p), const_spec(b1p), const_spec(w2p), const_spec(b2p),
        ],
        # Lane-dense (TB, 128) store; out_dtype=bf16 halves the writeback.
        # TODO(synk): fuse on-device action sampling / log-prob to emit a
        # narrow (TB, 8) result instead of the 128-wide prob slab.
        out_specs=pl.BlockSpec((TB, A_pad), lambda i: (i, 0)),
        compiler_params=pltpu.CompilerParams(
            # TB_MAX=1024 keeps per-tile VMEM small enough for v5e's 16 MiB
            # default scoped limit; no vmem_limit_bytes override needed.
            dimension_semantics=("parallel",),
        ),
        cost_estimate=pl.CostEstimate(
            flops=flops,
            transcendentals=B_pad * A_pad,
            bytes_accessed=bytes_accessed,
        ),
    )(x, w1p, b1p, w2p, b2p)
    return out[:B, :action_dim]


def init_params(key, state_dim, hidden_dim, action_dim):
    # Mimics PyTorch nn.Linear default init: U(-1/sqrt(fan_in), +1/sqrt(fan_in)).
    # Stored as (in_features, out_features) so the kernel computes x @ W + b.
    k1, k2, k3, k4 = jax.random.split(key, 4)
    lim1 = 1.0 / jnp.sqrt(state_dim)
    lim2 = 1.0 / jnp.sqrt(hidden_dim)
    w1 = jax.random.uniform(k1, (state_dim, hidden_dim), jnp.float32, -lim1, lim1)
    b1 = jax.random.uniform(k2, (1, hidden_dim), jnp.float32, -lim1, lim1)
    w2 = jax.random.uniform(k3, (hidden_dim, action_dim), jnp.float32, -lim2, lim2)
    b2 = jax.random.uniform(k4, (1, action_dim), jnp.float32, -lim2, lim2)
    return w1, b1, w2, b2


def pad_params(w1, b1, w2, b2):
    """Zero-pad hidden/action dims to 128 lanes; weights stored bf16 for the MXU.

    Exactness: padded hidden units are ReLU(0 + 0) = 0, their w2 rows are zero,
    and the padded b2 columns are set to -1e30 so the padded logits arrive
    already masked for the softmax (probability exactly 0). -1e30 (not -inf) is
    used so m - logit never produces NaN; the row max is always a real logit.
    """
    state_dim, hidden_dim = w1.shape
    action_dim = w2.shape[1]
    H_pad = _round_up(hidden_dim, LANE)
    A_pad = _round_up(action_dim, LANE)
    w1p = jnp.pad(w1, ((0, 0), (0, H_pad - hidden_dim))).astype(jnp.bfloat16)
    b1p = jnp.pad(b1, ((0, 0), (0, H_pad - hidden_dim)))                       # f32
    w2p = jnp.pad(w2, ((0, H_pad - hidden_dim), (0, A_pad - action_dim))).astype(jnp.bfloat16)
    b2p = jnp.pad(b2, ((0, 0), (0, A_pad - action_dim)),
                  constant_values=NEG_MASK)                                    # f32
    return w1p, b1p, w2p, b2p


def _ref_forward_f32(x, w1, b1, w2, b2):
    # Pure-f32 reference (matches the PyTorch module bit-for-bit in spirit).
    return jax.nn.softmax(jnp.maximum(x @ w1 + b1, 0.0) @ w2 + b2, axis=1)


def _ref_forward_bf16_matmul(x, w1, b1, w2, b2):
    # Same numerics as the kernel: bf16 MXU inputs, f32 accumulation + softmax.
    h = jnp.dot(x.astype(jnp.bfloat16), w1.astype(jnp.bfloat16),
                preferred_element_type=jnp.float32) + b1
    h = jnp.maximum(h, 0.0)
    logits = jnp.dot(h.astype(jnp.bfloat16), w2.astype(jnp.bfloat16),
                     preferred_element_type=jnp.float32) + b2
    return jax.nn.softmax(logits, axis=1)


if __name__ == "__main__":
    # Small shapes consistent with a typical A2C PolicyNet (e.g. CartPole).
    B, state_dim, hidden_dim, action_dim = 8, 4, 32, 2

    key = jax.random.PRNGKey(0)
    kx, kp, kx2 = jax.random.split(key, 3)
    x = jax.random.normal(kx, (B, state_dim), jnp.float32)
    w1, b1, w2, b2 = init_params(kp, state_dim, hidden_dim, action_dim)
    w1p, b1p, w2p, b2p = pad_params(w1, b1, w2, b2)

    # Default (f32 output) path.
    out = policy_net_forward(x, w1p, b1p, w2p, b2p, action_dim=action_dim)
    jax.block_until_ready(out)

    ref32 = _ref_forward_f32(x, w1, b1, w2, b2)
    ref16 = _ref_forward_bf16_matmul(x, w1, b1, w2, b2)
    assert out.shape == (B, action_dim), "wrong output shape"
    assert out.dtype == jnp.float32, "wrong output dtype"
    assert jnp.allclose(out, ref16, atol=1e-4, rtol=1e-4), "mismatch vs bf16-matmul reference"
    assert jnp.allclose(out, ref32, atol=2e-2, rtol=2e-2), "mismatch vs f32 reference"
    assert jnp.allclose(jnp.sum(out, axis=1), 1.0, atol=1e-4), "rows must sum to ~1"

    # bf16-output path (halved HBM writeback); looser tolerance for the cast.
    out_bf16 = policy_net_forward(x, w1p, b1p, w2p, b2p, action_dim=action_dim,
                                  out_dtype=jnp.bfloat16)
    jax.block_until_ready(out_bf16)
    assert out_bf16.dtype == jnp.bfloat16
    assert jnp.allclose(out_bf16.astype(jnp.float32), ref32, atol=2e-2, rtol=2e-2), \
        "bf16-output mismatch vs f32 reference"

    # Multi-tile (grid > 1) path used by real vectorized-env batches, including
    # a batch that is not a multiple of 8 (exercises the padding path).
    B_big = 2048 + 5
    x_big = jax.random.normal(kx2, (B_big, state_dim), jnp.float32)
    out_big = policy_net_forward(x_big, w1p, b1p, w2p, b2p, action_dim=action_dim)
    jax.block_until_ready(out_big)
    ref_big16 = _ref_forward_bf16_matmul(x_big, w1, b1, w2, b2)
    ref_big32 = _ref_forward_f32(x_big, w1, b1, w2, b2)
    assert out_big.shape == (B_big, action_dim), "wrong big-batch output shape"
    assert jnp.allclose(out_big, ref_big16, atol=1e-4, rtol=1e-4), "big-batch mismatch (bf16 ref)"
    assert jnp.allclose(out_big, ref_big32, atol=2e-2, rtol=2e-2), "big-batch mismatch (f32 ref)"
    assert jnp.allclose(jnp.sum(out_big, axis=1), 1.0, atol=1e-4), "big-batch rows must sum to ~1"

    print("KERNEL_OK")
</pallas_src>

<mosaic_0001>
module attributes {stable_mosaic.version = 11 : i64} {
  func.func @policy_net_kernel(%arg0: i32, %arg1: memref<8x4xf32, #tpu.memory_space<vmem>>, %arg2: memref<4x128xbf16, #tpu.memory_space<vmem>>, %arg3: memref<1x128xf32, #tpu.memory_space<vmem>>, %arg4: memref<128x128xbf16, #tpu.memory_space<vmem>>, %arg5: memref<1x128xf32, #tpu.memory_space<vmem>>, %arg6: memref<8x128xf32, #tpu.memory_space<vmem>>) attributes {dimension_semantics = [#tpu.dimension_semantics<parallel>], iteration_bounds = array<i64: 1>, scalar_prefetch = 0 : i64, scratch_operands = 0 : i64, tpu.core_type = #tpu.core_type<tc>, window_params = [{transform_indices = @transform_0, window_bounds = array<i64: 8, 4>}, {pipeline_mode = #tpu.pipeline_mode<synchronous>, transform_indices = @transform_1, window_bounds = array<i64: 4, 128>}, {pipeline_mode = #tpu.pipeline_mode<synchronous>, transform_indices = @transform_2, window_bounds = array<i64: 1, 128>}, {pipeline_mode = #tpu.pipeline_mode<synchronous>, transform_indices = @transform_3, window_bounds = array<i64: 128, 128>}, {pipeline_mode = #tpu.pipeline_mode<synchronous>, transform_indices = @transform_4, window_bounds = array<i64: 1, 128>}, {transform_indices = @transform_5, window_bounds = array<i64: 8, 128>}]} {
    %c0 = arith.constant 0 : index
    %c0_0 = arith.constant 0 : index
    %0 = vector.load %arg1[%c0, %c0_0] : memref<8x4xf32, #tpu.memory_space<vmem>>, vector<8x4xf32>
    %1 = arith.truncf %0 : vector<8x4xf32> to vector<8x4xbf16>
    %c0_1 = arith.constant 0 : index
    %c0_2 = arith.constant 0 : index
    %2 = vector.load %arg2[%c0_1, %c0_2] : memref<4x128xbf16, #tpu.memory_space<vmem>>, vector<4x128xbf16>
    %cst = arith.constant dense<0.000000e+00> : vector<8x128xf32>
    %3 = tpu.matmul %1, %2, %cst {dimension_numbers = #tpu.dot_dimension_numbers<[1], [0], [0], [1], [0, 0, 1, 1], [], []>} : vector<8x4xbf16>, vector<4x128xbf16>, vector<8x128xf32> -> vector<8x128xf32>
    %c0_3 = arith.constant 0 : index
    %c0_4 = arith.constant 0 : index
    %4 = vector.load %arg3[%c0_3, %c0_4] : memref<1x128xf32, #tpu.memory_space<vmem>>, vector<1x128xf32>
    %5 = vector.broadcast %4 : vector<1x128xf32> to vector<8x128xf32>
    %6 = arith.addf %3, %5 : vector<8x128xf32>
    %cst_5 = arith.constant 0.000000e+00 : f32
    %7 = vector.broadcast %cst_5 : f32 to vector<8x128xf32>
    %8 = arith.maximumf %6, %7 : vector<8x128xf32>
    %9 = arith.truncf %8 : vector<8x128xf32> to vector<8x128xbf16>
    %c0_6 = arith.constant 0 : index
    %c0_7 = arith.constant 0 : index
    %10 = vector.load %arg4[%c0_6, %c0_7] : memref<128x128xbf16, #tpu.memory_space<vmem>>, vector<128x128xbf16>
    %cst_8 = arith.constant dense<0.000000e+00> : vector<8x128xf32>
    %11 = tpu.matmul %9, %10, %cst_8 {dimension_numbers = #tpu.dot_dimension_numbers<[1], [0], [0], [1], [0, 0, 1, 1], [], []>} : vector<8x128xbf16>, vector<128x128xbf16>, vector<8x128xf32> -> vector<8x128xf32>
    %c0_9 = arith.constant 0 : index
    %c0_10 = arith.constant 0 : index
    %12 = vector.load %arg5[%c0_9, %c0_10] : memref<1x128xf32, #tpu.memory_space<vmem>>, vector<1x128xf32>
    %13 = vector.broadcast %12 : vector<1x128xf32> to vector<8x128xf32>
    %14 = arith.addf %11, %13 : vector<8x128xf32>
    %cst_11 = arith.constant dense<0xFF800000> : vector<8xf32>
    %15 = vector.multi_reduction <maximumf>, %14, %cst_11 [1] : vector<8x128xf32> to vector<8xf32>
    %16 = vector.shape_cast %15 : vector<8xf32> to vector<8x1xf32>
    %17 = vector.broadcast %16 : vector<8x1xf32> to vector<8x128xf32>
    %18 = arith.subf %14, %17 : vector<8x128xf32>
    %19 = math.exp %18 : vector<8x128xf32>
    %cst_12 = arith.constant dense<0.000000e+00> : vector<8xf32>
    %20 = vector.multi_reduction <add>, %19, %cst_12 [1] : vector<8x128xf32> to vector<8xf32>
    %21 = vector.shape_cast %20 : vector<8xf32> to vector<8x1xf32>
    %22 = vector.broadcast %21 : vector<8x1xf32> to vector<8x128xf32>
    %23 = arith.divf %19, %22 : vector<8x128xf32>
    %c0_13 = arith.constant 0 : index
    %c0_14 = arith.constant 0 : index
    %24 = vector.load %arg6[%c0_13, %c0_14] : memref<8x128xf32, #tpu.memory_space<vmem>>, vector<8x128xf32>
    tpu.vector_store %arg6[%c0_13, %c0_14], %23 {strides = array<i32>} : memref<8x128xf32, #tpu.memory_space<vmem>>, vector<8x128xf32>,
    return
  }
  func.func @transform_0(%arg0: i32) -> (i32, i32) {
    %c0_i32 = arith.constant 0 : i32
    %c0_i32_0 = arith.constant 0 : i32
    return %arg0, %c0_i32 : i32, i32
  }
  func.func @transform_1(%arg0: i32) -> (i32, i32) {
    %c0_i32 = arith.constant 0 : i32
    %c0_i32_0 = arith.constant 0 : i32
    %c0_i32_1 = arith.constant 0 : i32
    return %c0_i32, %c0_i32_0 : i32, i32
  }
  func.func @transform_2(%arg0: i32) -> (i32, i32) {
    %c0_i32 = arith.constant 0 : i32
    %c0_i32_0 = arith.constant 0 : i32
    %c0_i32_1 = arith.constant 0 : i32
    return %c0_i32, %c0_i32_0 : i32, i32
  }
  func.func @transform_3(%arg0: i32) -> (i32, i32) {
    %c0_i32 = arith.constant 0 : i32
    %c0_i32_0 = arith.constant 0 : i32
    %c0_i32_1 = arith.constant 0 : i32
    return %c0_i32, %c0_i32_0 : i32, i32
  }
  func.func @transform_4(%arg0: i32) -> (i32, i32) {
    %c0_i32 = arith.constant 0 : i32
    %c0_i32_0 = arith.constant 0 : i32
    %c0_i32_1 = arith.constant 0 : i32
    return %c0_i32, %c0_i32_0 : i32, i32
  }
  func.func @transform_5(%arg0: i32) -> (i32, i32) {
    %c0_i32 = arith.constant 0 : i32
    %c0_i32_0 = arith.constant 0 : i32
    return %arg0, %c0_i32 : i32, i32
  }
}

</mosaic_0001>

<bundles_post_ra>
// kernel: policy_net_forward.1
= control target key start
LH: loop header
LB: loop body
LE: loop exit
PB: predicated region body
PF: predicated region fallthrough
CT: control target
= control target key end

     0   :  { %10 = vsyncpa [#allocation3], 0  ;;  %s308_s18 = smov [#allocation2]   ;;  %s361_s0 = inlined_call_operand.vmem [shape: f32[8,4], index: 0, kind: input, shape index: {}]   ;;  %s362_s1 = inlined_call_operand.vmem [shape: bf16[4,128], index: 1, kind: input, shape index: {}]   ;;  %s363_s2 = inlined_call_operand.vmem [shape: f32[1,128], index: 2, kind: input, shape index: {}]   ;;  %s364_s3 = inlined_call_operand.hbm [shape: bf16[128,128], index: 3, kind: input, shape index: {}]   ;;  %s365_s4 = inlined_call_operand.vmem [shape: f32[1,128], index: 4, kind: input, shape index: {}]   ;;  %s366_s5 = inlined_call_operand.vmem [shape: f32[8,128], index: 5, kind: output, shape index: {}]  }
   0x1   :  { %s22_s19 = sshll.u32 %s308_s18, 4  ;;  %s23_s19 = int_to_ptr.vmem [resolvable:$true] %s22_s19 }
   0x2   :  { %s294_s20 = scalar_lea.vmem %s23_s19, 1024  ;;  %p299_p1 = scmp.lt.s32.totalorder %s23_s19, %s23_s19 }
   0x3   :  { %p295_p0 = scmp.ne.s32.totalorder %s23_s19, %s294_s20  ;;  %p300_p2 = scmp.lt.s32.totalorder %s294_s20, %s294_s20 }
   0x5   :  { %p301_p3 = por %p300_p2, %p299_p1 }
   0x7   :  { %p302_p4 = pnand %p301_p3, %p295_p0 }
   0x9   :  { %305 = shalt.err (!%p302_p4)
}
   0xa   :  { %s309_s21 = smov 64   ;;  %s310_s22 = smov 4  }
   0xb   :  { %28 = dma.hbm_to_vmem [thread:$0]  %s364_s3, 1024, %s23_s19, [#allocation3], %s309_s21, %s309_s21, %s310_s22  }
   0xc   :  { %306 = dma.done.wait [#allocation3], 1024  }
   0xd   :  { %307 = vsyncadd [#allocation3], 4294966272  ;;  %v311_v0 = vmov 0.0   ;;  %vm312_vm0 = vmmov 0   ;;  %vm49_vm1 = vcmask 1041408   ;;  %v35_v2 = vld [vmem:[%s361_s0] sm:$0xff] }
   0xe   :  { %243 = vmatprep.subr.bf16.mxu0 %v311_v0  ;;  %245 = vmatprep.mubr.msk.bf16.mxu0 %vm312_vm0, %v311_v0  ;;  %v37_v1 = vld [vmem:[%s362_s1] sm:$0x3]  ;;  %v36_v4 = vpack.c.bf16 %v35_v2, %v35_v2  ;;  %v274_v5 = vld [vmem:[#allocation2 + $0x38] sm:$0xff]   ;;  %vm45_vm2 = vcmask 31744   ;;  %v275_v6 = vld [vmem:[#allocation2 + $0x30] sm:$0xff]  }
   0xf   :  { %249 = vmatprep.subr.bf16.mxu1 %v311_v0  ;;  %265 = vmatprep.mubr.msk.bf16.mxu1 %vm312_vm0, %v311_v0  ;;  %v51_v3 = vsel %vm49_vm1, %v37_v1, 0  ;;  %v276_v7 = vld [vmem:[#allocation2 + $0x28] sm:$0xff]   ;;  %v277_v8 = vld [vmem:[#allocation2 + $0x20] sm:$0xff]   ;;  %v278_v9 = vld [vmem:[#allocation2 + $0x18] sm:$0xff]  }
  0x10   :  { %244 = vmatpush3.bf16.msra.mxu0 %v51_v3  ;;  %250 = vmatpush3.bf16.msra.mxu1 %v274_v5  ;;  %v279_v10 = vld [vmem:[#allocation2 + $0x10] sm:$0xff]   ;;  %v280_v11 = vld [vmem:[#allocation2 + $0x8] sm:$0xff]   ;;  %v281_v12 = vld [vmem:[#allocation2] sm:$0xff]  }
  0x11   :  { %251 = vmatprep.subr.bf16.mxu1 %v311_v0  ;;  %v221_v13 = vld [vmem:[%s363_s2] ss:$0 sm:$0xff] }
  0x12   :  { %v223_v21 = vld [vmem:[%s365_s4] ss:$0 sm:$0xff] }
  0x13   :  { %246 = vmatmul.mubr.msk.bf16.vlgmr.msra.gmra.mxu0 %vm45_vm2, %v36_v4 }
  0x14   :  { %252 = vmatpush3.bf16.msra.mxu1 %v275_v6 }
  0x15   :  { %253 = vmatprep.subr.bf16.mxu1 %v311_v0 }
  0x18   :  { %254 = vmatpush3.bf16.msra.mxu1 %v276_v7 }
  0x19   :  { %255 = vmatprep.subr.bf16.mxu1 %v311_v0 }
  0x1c   :  { %256 = vmatpush3.bf16.msra.mxu1 %v277_v8 }
  0x1d   :  { %257 = vmatprep.subr.bf16.mxu1 %v311_v0 }
  0x20   :  { %258 = vmatpush3.bf16.msra.mxu1 %v278_v9 }
  0x21   :  { %259 = vmatprep.subr.bf16.mxu1 %v311_v0 }
  0x24   :  { %260 = vmatpush3.bf16.msra.mxu1 %v279_v10 }
  0x25   :  { %261 = vmatprep.subr.bf16.mxu1 %v311_v0 }
  0x28   :  { %262 = vmatpush3.bf16.msra.mxu1 %v280_v11 }
  0x29   :  { %263 = vmatprep.subr.bf16.mxu1 %v311_v0 }
  0x2c   :  { %264 = vmatpush3.bf16.msra.mxu1 %v281_v12 }
  0xd3   :  { %v87_v14 = vpop.f32.mrf.mxu0 }
  0xd4   :  { %v88_v15 = vadd.f32 %v221_v13, %v87_v14 }
  0xd5   :  { %v247_v16 = vpop.f32.mrf.mxu0 }
  0xd6   :  { %v93_v17 = vmax.f32 %v88_v15, 0.0 }
  0xd7   :  { %v90_v18 = vpop.f32.mrf.mxu0 }
  0xd8   :  { %v94_v19 = vpack.c.bf16 %v93_v17, %v93_v17 }
  0xd9   :  { %v248_v20 = vpop.f32.mrf.mxu0 }
  0xda   :  { %266 = vmatmul.mubr.bf16.vlgmr.msra.gmra.mxu1 %v94_v19 }
 0x19a   :  { %v200_v22 = vpop.f32.mrf.mxu1 }
 0x19b   :  { %v201_v23 = vadd.f32 %v223_v21, %v200_v22 }
 0x19c   :  { %v267_v24 = vpop.f32.mrf.mxu1 }
 0x19d   :  { %206 = vmax.xlane.f32.xlu0 %v201_v23 }
 0x19e   :  { %v203_v25 = vpop.f32.mrf.mxu1 }
 0x1a0   :  { %v268_v26 = vpop.f32.mrf.mxu1 }
 0x226   :  { %v207_v27 = vpop.xlane.xlu0 %206 }
 0x227   :  { %v208_v28 = vsub.f32 %v201_v23, %v207_v27 }
 0x229   :  { %v209_v29 = vmul.f32 1.442695, %v208_v28 }
 0x22b   :  { %282 = vpow2.f32 %v209_v29 }
 0x238   :  { %v283_v30 = vpop.eup %282 }
 0x239   :  { %211 = vadd.xlane.f32.xlu0 %v283_v30 }
 0x2c2   :  { %v212_v31 = vpop.xlane.xlu0 %211 }
 0x2c3   :  { %284 = vrcp.f32 %v212_v31 }
 0x2d0   :  { %v285_v32 = vpop.eup %284 }
 0x2d1   :  { %v214_v33 = vmul.f32 %v285_v32, %v283_v30 }
 0x2d3   :  { %215 = vst [vmem:[%s366_s5] sm:$0xff] %v214_v33 }
 0x2d4   :  { %220 = vsyncpa [#allocation3], 1 }

</bundles_post_ra>
